<compile_context>
chip_gen: v5e
topology: v5e:2x2
jax: 0.10.0
libtpu: 0.0.40
codegen_flags: <defaults>
</compile_context>

<pallas_src>
import functools

import jax
import jax.numpy as jnp
from jax import lax
from jax.experimental import pallas as pl
from jax.experimental.pallas import tpu as pltpu


# ---------------------------------------------------------------------------
# Fused kernel: one batch element per grid step.
#   qkv = x @ W_qkv                               (one MXU call, N = 3*H*D)
#   per head: S = q_h k_h^T (scale pre-folded), causal mask, softmax, S @ v_h
#   y = concat_h(out_h);  o = y @ W_out^T + b     (W_out pre-transposed)
# ---------------------------------------------------------------------------
def _mha_kernel(x_ref, wqkv_ref, wo_ref, b_ref, o_ref, *, num_heads, head_sz):
    x = x_ref[0]                                     # (T, C)
    T = x.shape[0]
    hd = num_heads * head_sz

    # All Q/K/V for all heads in a single matmul (amortizes MXU fill/drain,
    # loads x from VMEM once).
    qkv = jnp.dot(x, wqkv_ref[...], preferred_element_type=jnp.float32)  # (T, 3*H*D)
    q = qkv[:, 0 * hd:1 * hd]                        # scale already folded in
    k = qkv[:, 1 * hd:2 * hd]
    v = qkv[:, 2 * hd:3 * hd]

    # Causal mask, built once and reused by every head.
    row = lax.broadcasted_iota(jnp.int32, (T, T), 0)
    col = lax.broadcasted_iota(jnp.int32, (T, T), 1)
    causal = col <= row
    neg_big = jnp.float32(-1e30)   # finite: exp underflows to 0, no NaN risk

    heads_out = []
    for h in range(num_heads):                       # static unroll (small H)
        sl = slice(h * head_sz, (h + 1) * head_sz)
        qh, kh, vh = q[:, sl], k[:, sl], v[:, sl]    # (T, D) each

        # q_h @ k_h^T without materializing a transpose: contract on dim 1.
        s = lax.dot_general(qh, kh, (((1,), (1,)), ((), ())),
                            preferred_element_type=jnp.float32)          # (T, T)
        s = jnp.where(causal, s, neg_big)

        # softmax along last axis (f32)
        m = jnp.max(s, axis=-1, keepdims=True)
        p = jnp.exp(s - m)
        l = jnp.sum(p, axis=-1, keepdims=True)
        p = p * pl.reciprocal(l, approx=False)       # approx=True OK if tol relaxed

        heads_out.append(
            jnp.dot(p, vh, preferred_element_type=jnp.float32))          # (T, D)

    y = jnp.concatenate(heads_out, axis=-1)          # (T, H*D) lane-concat
    o_ref[0] = (jnp.dot(y, wo_ref[...], preferred_element_type=jnp.float32)
                + b_ref[...])                        # (T, F), lane-dense store


# ---------------------------------------------------------------------------
# One-time parameter preparation (outside the kernel, not per call-step):
#   * stack per-head W_q/W_k/W_v into a single (C, 3*H*D) matrix
#   * fold 1/sqrt(D) into the Q columns
#   * pre-transpose W_out to (H*D, F)
# ---------------------------------------------------------------------------
def prepare_params(params):
    wq, wk, wv = params["wq"], params["wk"], params["wv"]   # (H, C, D) each
    w_out, b_out = params["w_out"], params["b_out"]         # (F, H*D), (F,)
    H, C, D = wq.shape
    F = w_out.shape[0]

    def stack(w):                        # (H, C, D) -> (C, H*D)
        return jnp.transpose(w, (1, 0, 2)).reshape(C, H * D)

    scale = jnp.float32(D) ** -0.5
    w_qkv = jnp.concatenate([stack(wq) * scale, stack(wk), stack(wv)], axis=1)
    return {
        "w_qkv": w_qkv,                  # (C, 3*H*D)
        "w_out_t": w_out.T,              # (H*D, F)
        "b_out": b_out.reshape(1, F),    # (1, F)
        "num_heads": H,
        "head_sz": D,
    }


def multi_head_attention(x, prepared):
    """x: (B, T, C). Returns (B, T, F)."""
    B, T, C = x.shape
    H = prepared["num_heads"]
    D = prepared["head_sz"]
    HD = H * D
    F = prepared["w_out_t"].shape[1]

    kernel = functools.partial(_mha_kernel, num_heads=H, head_sz=D)
    return pl.pallas_call(
        kernel,
        out_shape=jax.ShapeDtypeStruct((B, T, F), jnp.float32),
        grid_spec=pltpu.PrefetchScalarGridSpec(
            num_scalar_prefetch=0,
            grid=(B,),
            in_specs=[
                pl.BlockSpec((1, T, C), lambda b: (b, 0, 0)),
                # Weights: constant index_map -> DMA'd once, resident across grid.
                pl.BlockSpec((C, 3 * HD), lambda b: (0, 0)),
                pl.BlockSpec((HD, F), lambda b: (0, 0)),
                pl.BlockSpec((1, F), lambda b: (0, 0)),
            ],
            out_specs=pl.BlockSpec((1, T, F), lambda b: (b, 0, 0)),
        ),
        compiler_params=pltpu.CompilerParams(
            dimension_semantics=("parallel",)),  # batch axis feeds both v7x TCs
    )(x, prepared["w_qkv"], prepared["w_out_t"], prepared["b_out"])
    # TODO(synk): for long sequences (T >~ 2k) switch the per-head (T,T) score
    # materialization to a flash-style KV-tiled online softmax (v7x 64 MiB VMEM).


# ---------------------------------------------------------------------------
# Pure-JAX reference (mirrors the PyTorch module exactly).
# ---------------------------------------------------------------------------
def reference(x, params):
    wq, wk, wv, w_out, b_out = (params["wq"], params["wk"], params["wv"],
                                params["w_out"], params["b_out"])
    B, T, C = x.shape
    H, _, D = wq.shape
    q = jnp.einsum("btc,hcd->bhtd", x, wq)
    k = jnp.einsum("btc,hcd->bhtd", x, wk)
    v = jnp.einsum("btc,hcd->bhtd", x, wv)
    s = jnp.einsum("bhtd,bhsd->bhts", q, k) / (D ** 0.5)
    mask = jnp.tril(jnp.ones((T, T), dtype=bool))
    s = jnp.where(mask, s, -jnp.inf)
    p = jax.nn.softmax(s, axis=-1)
    o = jnp.einsum("bhts,bhsd->bhtd", p, v)
    y = jnp.transpose(o, (0, 2, 1, 3)).reshape(B, T, H * D)
    return y @ w_out.T + b_out


if __name__ == "__main__":
    # Module hyperparameters (small, consistent with the forward pass)
    B = 2            # batch
    T = 8            # sequence length == context_sz
    C = 32           # in_features
    H = 4            # num_heads
    D = 8            # head_sz
    F = 32           # out_features (defaults to in_features)

    key = jax.random.PRNGKey(0)
    kx, kq, kk, kv, kw, kb = jax.random.split(key, 6)

    x = jax.random.normal(kx, (B, T, C), dtype=jnp.float32)

    # Per-head projection weights stored as (H, C, D) = already-transposed
    # nn.Linear(fan_in, head_sz, bias=False) weights, stacked over heads.
    params = {
        "wq": jax.random.normal(kq, (H, C, D), dtype=jnp.float32) * 0.1,
        "wk": jax.random.normal(kk, (H, C, D), dtype=jnp.float32) * 0.1,
        "wv": jax.random.normal(kv, (H, C, D), dtype=jnp.float32) * 0.1,
        # nn.Linear(head_sz * num_heads, out_features): weight (F, H*D), bias (F,)
        "w_out": jax.random.normal(kw, (F, H * D), dtype=jnp.float32) * 0.1,
        "b_out": jax.random.normal(kb, (F,), dtype=jnp.float32) * 0.1,
    }

    prepared = prepare_params(params)          # one-time weight prep
    out = multi_head_attention(x, prepared)
    out = jax.block_until_ready(out)

    ref = reference(x, params)
    assert out.shape == (B, T, F)
    assert jnp.allclose(out, ref, atol=1e-5, rtol=1e-5), "mismatch vs reference"

    print("KERNEL_OK")
</pallas_src>

<mosaic_0001>
module attributes {stable_mosaic.version = 11 : i64} {
  func.func @_mha_kernel(%arg0: i32, %arg1: memref<1x8x32xf32, #tpu.memory_space<vmem>>, %arg2: memref<32x96xf32, #tpu.memory_space<vmem>>, %arg3: memref<32x32xf32, #tpu.memory_space<vmem>>, %arg4: memref<1x32xf32, #tpu.memory_space<vmem>>, %arg5: memref<1x8x32xf32, #tpu.memory_space<vmem>>) attributes {dimension_semantics = [#tpu.dimension_semantics<parallel>], iteration_bounds = array<i64: 2>, scalar_prefetch = 0 : i64, scratch_operands = 0 : i64, tpu.core_type = #tpu.core_type<tc>, window_params = [{transform_indices = @transform_0, window_bounds = array<i64: 1, 8, 32>}, {pipeline_mode = #tpu.pipeline_mode<synchronous>, transform_indices = @transform_1, window_bounds = array<i64: 32, 96>}, {pipeline_mode = #tpu.pipeline_mode<synchronous>, transform_indices = @transform_2, window_bounds = array<i64: 32, 32>}, {pipeline_mode = #tpu.pipeline_mode<synchronous>, transform_indices = @transform_3, window_bounds = array<i64: 1, 32>}, {transform_indices = @transform_4, window_bounds = array<i64: 1, 8, 32>}]} {
    %c0 = arith.constant 0 : index
    %c0_0 = arith.constant 0 : index
    %c0_1 = arith.constant 0 : index
    %0 = vector.load %arg1[%c0, %c0_0, %c0_1] : memref<1x8x32xf32, #tpu.memory_space<vmem>>, vector<1x8x32xf32>
    %1 = vector.shape_cast %0 : vector<1x8x32xf32> to vector<8x32xf32>
    %c0_2 = arith.constant 0 : index
    %c0_3 = arith.constant 0 : index
    %2 = vector.load %arg2[%c0_2, %c0_3] : memref<32x96xf32, #tpu.memory_space<vmem>>, vector<32x96xf32>
    %cst = arith.constant dense<0.000000e+00> : vector<8x96xf32>
    %3 = tpu.matmul %1, %2, %cst {dimension_numbers = #tpu.dot_dimension_numbers<[1], [0], [0], [1], [0, 0, 1, 1], [], []>} : vector<8x32xf32>, vector<32x96xf32>, vector<8x96xf32> -> vector<8x96xf32>
    %4 = vector.extract_strided_slice %3 {offsets = [0, 0], sizes = [8, 32], strides = [1, 1]} : vector<8x96xf32> to vector<8x32xf32>
    %5 = vector.extract_strided_slice %3 {offsets = [0, 32], sizes = [8, 32], strides = [1, 1]} : vector<8x96xf32> to vector<8x32xf32>
    %6 = vector.extract_strided_slice %3 {offsets = [0, 64], sizes = [8, 32], strides = [1, 1]} : vector<8x96xf32> to vector<8x32xf32>
    %7 = tpu.iota {dimensions = array<i32: 0>} : vector<8x8xi32>
    %8 = tpu.iota {dimensions = array<i32: 1>} : vector<8x8xi32>
    %9 = arith.cmpi sle, %8, %7 : vector<8x8xi32>
    %10 = vector.extract_strided_slice %4 {offsets = [0, 0], sizes = [8, 8], strides = [1, 1]} : vector<8x32xf32> to vector<8x8xf32>
    %11 = vector.extract_strided_slice %5 {offsets = [0, 0], sizes = [8, 8], strides = [1, 1]} : vector<8x32xf32> to vector<8x8xf32>
    %12 = vector.extract_strided_slice %6 {offsets = [0, 0], sizes = [8, 8], strides = [1, 1]} : vector<8x32xf32> to vector<8x8xf32>
    %cst_4 = arith.constant dense<0.000000e+00> : vector<8x8xf32>
    %13 = tpu.matmul %10, %11, %cst_4 {dimension_numbers = #tpu.dot_dimension_numbers<[1], [1], [0], [0], [0, 0, 1, 0], [], []>} : vector<8x8xf32>, vector<8x8xf32>, vector<8x8xf32> -> vector<8x8xf32>
    %cst_5 = arith.constant -1.000000e+30 : f32
    %14 = vector.broadcast %cst_5 : f32 to vector<8x8xf32>
    %15 = arith.select %9, %13, %14 : vector<8x8xi1>, vector<8x8xf32>
    %cst_6 = arith.constant dense<0xFF800000> : vector<8xf32>
    %16 = vector.multi_reduction <maximumf>, %15, %cst_6 [1] : vector<8x8xf32> to vector<8xf32>
    %17 = vector.shape_cast %16 : vector<8xf32> to vector<8x1xf32>
    %18 = vector.broadcast %17 : vector<8x1xf32> to vector<8x8xf32>
    %19 = arith.subf %15, %18 : vector<8x8xf32>
    %20 = math.exp %19 : vector<8x8xf32>
    %cst_7 = arith.constant dense<0.000000e+00> : vector<8xf32>
    %21 = vector.multi_reduction <add>, %20, %cst_7 [1] : vector<8x8xf32> to vector<8xf32>
    %22 = vector.shape_cast %21 : vector<8xf32> to vector<8x1xf32>
    %23 = tpu.reciprocal %22 : vector<8x1xf32> -> vector<8x1xf32>
    %24 = vector.broadcast %23 : vector<8x1xf32> to vector<8x8xf32>
    %25 = arith.mulf %20, %24 : vector<8x8xf32>
    %cst_8 = arith.constant dense<0.000000e+00> : vector<8x8xf32>
    %26 = tpu.matmul %25, %12, %cst_8 {dimension_numbers = #tpu.dot_dimension_numbers<[1], [0], [0], [1], [0, 0, 1, 1], [], []>} : vector<8x8xf32>, vector<8x8xf32>, vector<8x8xf32> -> vector<8x8xf32>
    %27 = vector.extract_strided_slice %4 {offsets = [0, 8], sizes = [8, 8], strides = [1, 1]} : vector<8x32xf32> to vector<8x8xf32>
    %28 = vector.extract_strided_slice %5 {offsets = [0, 8], sizes = [8, 8], strides = [1, 1]} : vector<8x32xf32> to vector<8x8xf32>
    %29 = vector.extract_strided_slice %6 {offsets = [0, 8], sizes = [8, 8], strides = [1, 1]} : vector<8x32xf32> to vector<8x8xf32>
    %cst_9 = arith.constant dense<0.000000e+00> : vector<8x8xf32>
    %30 = tpu.matmul %27, %28, %cst_9 {dimension_numbers = #tpu.dot_dimension_numbers<[1], [1], [0], [0], [0, 0, 1, 0], [], []>} : vector<8x8xf32>, vector<8x8xf32>, vector<8x8xf32> -> vector<8x8xf32>
    %cst_10 = arith.constant -1.000000e+30 : f32
    %31 = vector.broadcast %cst_10 : f32 to vector<8x8xf32>
    %32 = arith.select %9, %30, %31 : vector<8x8xi1>, vector<8x8xf32>
    %cst_11 = arith.constant dense<0xFF800000> : vector<8xf32>
    %33 = vector.multi_reduction <maximumf>, %32, %cst_11 [1] : vector<8x8xf32> to vector<8xf32>
    %34 = vector.shape_cast %33 : vector<8xf32> to vector<8x1xf32>
    %35 = vector.broadcast %34 : vector<8x1xf32> to vector<8x8xf32>
    %36 = arith.subf %32, %35 : vector<8x8xf32>
    %37 = math.exp %36 : vector<8x8xf32>
    %cst_12 = arith.constant dense<0.000000e+00> : vector<8xf32>
    %38 = vector.multi_reduction <add>, %37, %cst_12 [1] : vector<8x8xf32> to vector<8xf32>
    %39 = vector.shape_cast %38 : vector<8xf32> to vector<8x1xf32>
    %40 = tpu.reciprocal %39 : vector<8x1xf32> -> vector<8x1xf32>
    %41 = vector.broadcast %40 : vector<8x1xf32> to vector<8x8xf32>
    %42 = arith.mulf %37, %41 : vector<8x8xf32>
    %cst_13 = arith.constant dense<0.000000e+00> : vector<8x8xf32>
    %43 = tpu.matmul %42, %29, %cst_13 {dimension_numbers = #tpu.dot_dimension_numbers<[1], [0], [0], [1], [0, 0, 1, 1], [], []>} : vector<8x8xf32>, vector<8x8xf32>, vector<8x8xf32> -> vector<8x8xf32>
    %44 = vector.extract_strided_slice %4 {offsets = [0, 16], sizes = [8, 8], strides = [1, 1]} : vector<8x32xf32> to vector<8x8xf32>
    %45 = vector.extract_strided_slice %5 {offsets = [0, 16], sizes = [8, 8], strides = [1, 1]} : vector<8x32xf32> to vector<8x8xf32>
    %46 = vector.extract_strided_slice %6 {offsets = [0, 16], sizes = [8, 8], strides = [1, 1]} : vector<8x32xf32> to vector<8x8xf32>
    %cst_14 = arith.constant dense<0.000000e+00> : vector<8x8xf32>
    %47 = tpu.matmul %44, %45, %cst_14 {dimension_numbers = #tpu.dot_dimension_numbers<[1], [1], [0], [0], [0, 0, 1, 0], [], []>} : vector<8x8xf32>, vector<8x8xf32>, vector<8x8xf32> -> vector<8x8xf32>
    %cst_15 = arith.constant -1.000000e+30 : f32
    %48 = vector.broadcast %cst_15 : f32 to vector<8x8xf32>
    %49 = arith.select %9, %47, %48 : vector<8x8xi1>, vector<8x8xf32>
    %cst_16 = arith.constant dense<0xFF800000> : vector<8xf32>
    %50 = vector.multi_reduction <maximumf>, %49, %cst_16 [1] : vector<8x8xf32> to vector<8xf32>
    %51 = vector.shape_cast %50 : vector<8xf32> to vector<8x1xf32>
    %52 = vector.broadcast %51 : vector<8x1xf32> to vector<8x8xf32>
    %53 = arith.subf %49, %52 : vector<8x8xf32>
    %54 = math.exp %53 : vector<8x8xf32>
    %cst_17 = arith.constant dense<0.000000e+00> : vector<8xf32>
    %55 = vector.multi_reduction <add>, %54, %cst_17 [1] : vector<8x8xf32> to vector<8xf32>
    %56 = vector.shape_cast %55 : vector<8xf32> to vector<8x1xf32>
    %57 = tpu.reciprocal %56 : vector<8x1xf32> -> vector<8x1xf32>
    %58 = vector.broadcast %57 : vector<8x1xf32> to vector<8x8xf32>
    %59 = arith.mulf %54, %58 : vector<8x8xf32>
    %cst_18 = arith.constant dense<0.000000e+00> : vector<8x8xf32>
    %60 = tpu.matmul %59, %46, %cst_18 {dimension_numbers = #tpu.dot_dimension_numbers<[1], [0], [0], [1], [0, 0, 1, 1], [], []>} : vector<8x8xf32>, vector<8x8xf32>, vector<8x8xf32> -> vector<8x8xf32>
    %61 = vector.extract_strided_slice %4 {offsets = [0, 24], sizes = [8, 8], strides = [1, 1]} : vector<8x32xf32> to vector<8x8xf32>
    %62 = vector.extract_strided_slice %5 {offsets = [0, 24], sizes = [8, 8], strides = [1, 1]} : vector<8x32xf32> to vector<8x8xf32>
    %63 = vector.extract_strided_slice %6 {offsets = [0, 24], sizes = [8, 8], strides = [1, 1]} : vector<8x32xf32> to vector<8x8xf32>
    %cst_19 = arith.constant dense<0.000000e+00> : vector<8x8xf32>
    %64 = tpu.matmul %61, %62, %cst_19 {dimension_numbers = #tpu.dot_dimension_numbers<[1], [1], [0], [0], [0, 0, 1, 0], [], []>} : vector<8x8xf32>, vector<8x8xf32>, vector<8x8xf32> -> vector<8x8xf32>
    %cst_20 = arith.constant -1.000000e+30 : f32
    %65 = vector.broadcast %cst_20 : f32 to vector<8x8xf32>
    %66 = arith.select %9, %64, %65 : vector<8x8xi1>, vector<8x8xf32>
    %cst_21 = arith.constant dense<0xFF800000> : vector<8xf32>
    %67 = vector.multi_reduction <maximumf>, %66, %cst_21 [1] : vector<8x8xf32> to vector<8xf32>
    %68 = vector.shape_cast %67 : vector<8xf32> to vector<8x1xf32>
    %69 = vector.broadcast %68 : vector<8x1xf32> to vector<8x8xf32>
    %70 = arith.subf %66, %69 : vector<8x8xf32>
    %71 = math.exp %70 : vector<8x8xf32>
    %cst_22 = arith.constant dense<0.000000e+00> : vector<8xf32>
    %72 = vector.multi_reduction <add>, %71, %cst_22 [1] : vector<8x8xf32> to vector<8xf32>
    %73 = vector.shape_cast %72 : vector<8xf32> to vector<8x1xf32>
    %74 = tpu.reciprocal %73 : vector<8x1xf32> -> vector<8x1xf32>
    %75 = vector.broadcast %74 : vector<8x1xf32> to vector<8x8xf32>
    %76 = arith.mulf %71, %75 : vector<8x8xf32>
    %cst_23 = arith.constant dense<0.000000e+00> : vector<8x8xf32>
    %77 = tpu.matmul %76, %63, %cst_23 {dimension_numbers = #tpu.dot_dimension_numbers<[1], [0], [0], [1], [0, 0, 1, 1], [], []>} : vector<8x8xf32>, vector<8x8xf32>, vector<8x8xf32> -> vector<8x8xf32>
    %78 = tpu.concatenate %26, %43, %60, %77 in 1 : vector<8x8xf32>, vector<8x8xf32>, vector<8x8xf32>, vector<8x8xf32> -> vector<8x32xf32>
    %c0_24 = arith.constant 0 : index
    %c0_25 = arith.constant 0 : index
    %79 = vector.load %arg3[%c0_24, %c0_25] : memref<32x32xf32, #tpu.memory_space<vmem>>, vector<32x32xf32>
    %cst_26 = arith.constant dense<0.000000e+00> : vector<8x32xf32>
    %80 = tpu.matmul %78, %79, %cst_26 {dimension_numbers = #tpu.dot_dimension_numbers<[1], [0], [0], [1], [0, 0, 1, 1], [], []>} : vector<8x32xf32>, vector<32x32xf32>, vector<8x32xf32> -> vector<8x32xf32>
    %c0_27 = arith.constant 0 : index
    %c0_28 = arith.constant 0 : index
    %81 = vector.load %arg4[%c0_27, %c0_28] : memref<1x32xf32, #tpu.memory_space<vmem>>, vector<1x32xf32>
    %82 = vector.broadcast %81 : vector<1x32xf32> to vector<8x32xf32>
    %83 = arith.addf %80, %82 : vector<8x32xf32>
    %c0_29 = arith.constant 0 : index
    %c0_30 = arith.constant 0 : index
    %c0_31 = arith.constant 0 : index
    %84 = vector.load %arg5[%c0_29, %c0_30, %c0_31] : memref<1x8x32xf32, #tpu.memory_space<vmem>>, vector<1x8x32xf32>
    %85 = vector.shape_cast %84 : vector<1x8x32xf32> to vector<8x32xf32>
    %86 = vector.shape_cast %83 : vector<8x32xf32> to vector<1x8x32xf32>
    tpu.vector_store %arg5[%c0_29, %c0_30, %c0_31], %86 {strides = array<i32>} : memref<1x8x32xf32, #tpu.memory_space<vmem>>, vector<1x8x32xf32>,
    return
  }
  func.func @transform_0(%arg0: i32) -> (i32, i32, i32) {
    %c0_i32 = arith.constant 0 : i32
    %c0_i32_0 = arith.constant 0 : i32
    %c0_i32_1 = arith.constant 0 : i32
    return %arg0, %c0_i32, %c0_i32_0 : i32, i32, i32
  }
  func.func @transform_1(%arg0: i32) -> (i32, i32) {
    %c0_i32 = arith.constant 0 : i32
    %c0_i32_0 = arith.constant 0 : i32
    %c0_i32_1 = arith.constant 0 : i32
    return %c0_i32, %c0_i32_0 : i32, i32
  }
  func.func @transform_2(%arg0: i32) -> (i32, i32) {
    %c0_i32 = arith.constant 0 : i32
    %c0_i32_0 = arith.constant 0 : i32
    %c0_i32_1 = arith.constant 0 : i32
    return %c0_i32, %c0_i32_0 : i32, i32
  }
  func.func @transform_3(%arg0: i32) -> (i32, i32) {
    %c0_i32 = arith.constant 0 : i32
    %c0_i32_0 = arith.constant 0 : i32
    %c0_i32_1 = arith.constant 0 : i32
    return %c0_i32, %c0_i32_0 : i32, i32
  }
  func.func @transform_4(%arg0: i32) -> (i32, i32, i32) {
    %c0_i32 = arith.constant 0 : i32
    %c0_i32_0 = arith.constant 0 : i32
    %c0_i32_1 = arith.constant 0 : i32
    return %arg0, %c0_i32, %c0_i32_0 : i32, i32, i32
  }
}

</mosaic_0001>

<bundles_post_ra>
// kernel: tpu_custom_call.1
= control target key start
LH: loop header
LB: loop body
LE: loop exit
PB: predicated region body
PF: predicated region fallthrough
CT: control target
= control target key end

     0   :  { %9 = vsyncpa [#allocation3], 0  ;;  %s1296_s0 = inlined_call_operand.hbm [shape: f32[2,8,32], index: 0, kind: input, shape index: {}]   ;;  %s1297_s1 = inlined_call_operand.hbm [shape: f32[32,96], index: 1, kind: input, shape index: {}]   ;;  %s1298_s2 = inlined_call_operand.hbm [shape: f32[32,32], index: 2, kind: input, shape index: {}]   ;;  %s1299_s3 = inlined_call_operand.vmem [shape: f32[1,32], index: 3, kind: input, shape index: {}]   ;;  %s1300_s4 = inlined_call_operand.hbm [shape: f32[2,8,32], index: 4, kind: output, shape index: {}]  }
   0x1   :  { %11 = vsyncpa [#allocation3 + $0x1], 0 }
   0x2   :  { %12 = vsyncpa [#allocation6], 0 }
   0x3   :  { %13 = vsyncpa [#allocation4], 0 }
   0x4   :  { %15 = vsyncpa [#allocation4 + $0x1], 0  ;;  %s1087_s15 = smov 0   ;;  %s1089_s16 = smov 0  }
   0x5   :  { %s1091_s17 = smov 0   ;;  %s1093_s18 = smov 0  }
   0x6 LB: > { %s152_s21 = sshll.u32 %s1297_s1, 4  ;;  %s1111_s22 = sadd.s32 4294967295, %s1042_s18   ;;  %s1042_s18 = sphi %s1093_s18, %s1311_s18   ;;  %s1038_s17 = sphi %s1091_s17, %s1310_s17   ;;  %s1034_s16 = sphi %s1089_s16, %s1309_s16   ;;  %s1030_s15 = sphi %s1087_s15, %s1308_s15   ;;  %s153_s21 = int_to_ptr.hbm [resolvable:$true] %s152_s21 }
   0x7   : > { %p753_p0 = scmp.ge.s32.totalorder %s1042_s18, 1  ;;  %p42_p1 = scmp.eq.s32.totalorder %s1111_s22, 0 }
   0x8   : > { %p141_p2 = scmp.lt.s32.totalorder %s1042_s18, 3  ;;  %s1044_s24 = smov [#allocation5]  }
   0x9   : > { %s154_s25 = sshll.u32 %s1044_s24, 4  ;;  %s166_s28 = sshll.u32 %s1298_s2, 4  ;;  %s155_s25 = int_to_ptr.vmem [resolvable:$true] %s154_s25  ;;  %s167_s28 = int_to_ptr.hbm [resolvable:$true] %s166_s28 }
   0xa   : > { %p1116_p3 = pnand %p753_p0, %p141_p2  ;;  %s1045_s29 = smov [#allocation7]  }
   0xb   : > { %s168_s30 = sshll.u32 %s1045_s29, 4  ;;  %s1046_s5 = smov 128   ;;  %s169_s30 = int_to_ptr.vmem [resolvable:$true] %s168_s30 }
   0xc   : > { %p794_p4 = pneg %p1116_p3  ;;  %s1047_s6 = smov 8  }
   0xd   : > { %s752_s7 = sadd.s32 4294967294, %s1042_s18   ;;  %s1130_s8 = sadd.s32 1, %s1042_s18  }
   0xe   : > { %p795_p6 = pnand %p794_p4, %p42_p1  ;;  %s25_s9 = ssub.s32 %s1042_s18, %s1130_s8 }
   0xf   : > { %s28_s10 = sadd.s32 1, %s1038_s17  ;;  %p26_p7 = scmp.eq.s32.totalorder %s25_s9, 0 }
  0x10   : > { %797 = dma.hbm_to_vmem [thread:$0]  (!%p795_p6), %s153_s21, 512, %s155_s25, [#allocation6], %s1046_s5, %s1046_s5, %s1047_s6  }
  0x11   : > { %800 = dma.hbm_to_vmem [thread:$0]  (!%p795_p6), %s167_s28, 512, %s169_s30, [#allocation6], %s1046_s5, %s1046_s5, %s1047_s6  }
  0x12   : > { %p35_p8 = scmp.ne.s32.totalorder %s1038_s17, %s1034_s16  ;;  %p36_p9 = scmp.eq.s32.totalorder %s1042_s18, 0 }
  0x13   : > { %p41_p10 = scmp.ne.s32.totalorder %s1034_s16, %s1030_s15  ;;  %p128_p13 = scmp.eq.s32.totalorder %s1111_s22, 1 }
  0x14   : > { %s1141_s11 = scalar_select %p26_p7, %s1038_s17, %s28_s10  }
  0x15   : > { %p1143_p11 = por %p36_p9, %p35_p8  ;;  %p1149_p12 = por %p42_p1, %p41_p10 }
  0x16   : > { %p134_p0 = scmp.eq.s32.totalorder %s752_s7, 1  ;;  %p811_p2 = scmp.lt.s32.totalorder %s1042_s18, 2 }
  0x17   : > { %s185_s14 = sand.u32 1, %s1038_s17   ;;  %p1156_p4 = por %p128_p13, %p35_p8 }
  0x18   : > { %p1160_p6 = por %p134_p0, %p41_p10  ;;  %s757_s21 = sshll.u32 %s185_s14, 3 }
  0x19   : > { %s758_s24 = sshll.u32 %s1042_s18, 3  ;;  %s189_s28 = scalar_lea.vmem [#allocation2], %s757_s21 }
  0x1a   : > { %s193_s27 = scalar_lea.hbm %s1296_s0, %s758_s24  ;;  %s197_s29 = sshll.u32 %s189_s28, 4  ;;  %s198_s29 = int_to_ptr.vmem [resolvable:$true] %s197_s29 }
  0x1b   : > { %s195_s30 = sshll.u32 %s193_s27, 4  ;;  %p1170_p7 = pnand %p811_p2, %p1143_p11  ;;  %s196_s30 = int_to_ptr.hbm [resolvable:$true] %s195_s30 }
  0x1c   : > { %s186_s6 = scalar_lea.sflag [#allocation3], %s185_s14  ;;  %s942_s7 = sshra.s32 %s196_s30, 4  ;;  %s943_s7 = int_to_ptr.hbm [resolvable:$true] %s942_s7 }
  0x1d   : > { %s944_s9 = scalar_lea.hbm %s943_s7, 8  ;;  %p946_p9 = pneg %p1170_p7 }
  0x1e   : > { %p945_p8 = scmp.ne.s32.totalorder %s943_s7, %s944_s9  ;;  %s949_s24 = scalar_lea.hbm %s1296_s0, 16 }
  0x1f   : > { %p950_p11 = scmp.lt.s32.totalorder %s943_s7, %s1296_s0  ;;  %p951_p0 = scmp.lt.s32.totalorder %s949_s24, %s944_s9 }
  0x20   : > { %p947_p10 = pnand %p946_p9, %p945_p8 }
  0x21   : > { %p952_p2 = por %p951_p0, %p950_p11 }
  0x22   : > { %p948_p13 = pneg %p947_p10 }
  0x24   : > { %p953_p5 = pnand %p952_p2, %p948_p13 }
  0x26   : > { %956 = shalt.err (!%p953_p5)
}
  0x27   : > { %804 = dma.hbm_to_vmem [thread:$0]  (!%p1170_p7), %s196_s30, 128, %s198_s29, %s186_s6  }
  0x28   : > { %206 = sbr.rel (%p1116_p3) target bundleno = 1100 (0x44c), region = 36  ;;  %s1187_s14 = sand.u32 (!%p1116_p3), 1, %s1034_s16  }
  0x29   : > { %s760_s26 = sshll.u32 (!%p1116_p3), %s1187_s14, 3  ;;  %s209_s27 = scalar_lea.sflag (!%p1116_p3), [#allocation3], %s1187_s14 }
  0x2a   : > { %s212_s28 = scalar_lea.vmem (!%p1116_p3), [#allocation2], %s760_s26 }
  0x2d   : > { %1017 = dma.done.wait (%p1149_p12), %s209_s27, 128  }
  0x2e   : > { %1019 = vsyncadd (%p1149_p12), %s209_s27, 4294967168 }
  0x2f   : > { %1021 = dma.done.wait (%p42_p1), [#allocation6], 1024  }
  0x30   : > { %1023 = vsyncadd (%p42_p1), [#allocation6], 4294966272  ;;  %v252_v0 = vld [vmem:[#allocation5 + $0x18] sm:$0xff]  ;;  %v251_v1 = vld [vmem:[#allocation5 + $0x10] sm:$0xff]  ;;  %vm253_vm0 = vcmask 261120   ;;  %s1048_s23 = smov 72   ;;  %v277_v13 = vlaneseq }
  0x31   : > { %269 = vmatpush.msra.mxu0 %v252_v0  ;;  %v250_v2 = vld [vmem:[#allocation5 + $0x8] sm:$0xff]  ;;  %v249_v3 = vld [vmem:[#allocation5] sm:$0xff]  ;;  %v248_v4 = vld [vmem:[%s212_s28] sm:$0xff]  ;;  %s1049_s13 = smov 120   ;;  %s1050_s29 = smov 96   ;;  %vm285_vm1 = vcmask 64512  }
  0x32   : > { %s1051_s30 = smov 112   ;;  %s1052_s5 = smov 80   ;;  %v278_v14 = vshrl.u32 %v277_v13, 7  ;;  %v280_v15 = vand.u32 127, %v277_v13 }
  0x33   : > { %270 = vmatpush.msra.mxu0 %v251_v1  ;;  %s1053_s6 = smov 88   ;;  %s1054_s7 = smov 104  }
  0x34   : > { %vm281_vm2 = vcmp.le.s32.totalorder %v280_v15, %v278_v14  ;;  %s1055_s9 = smov 56   ;;  %s1056_s10 = smov 40  }
  0x35   : > { %271 = vmatpush.msra.mxu0 %v250_v2  ;;  %s1057_s21 = smov 64   ;;  %s1058_s24 = smov 48  }
  0x36   : > { %s1059_s25 = smov 8   ;;  %s1060_s12 = smov 24  }
  0x37   : > { %272 = vmatpush.msra.mxu0 %v249_v3  ;;  %s1061_s27 = smov 16   ;;  %s779_s28 = sshll.u32 %s1111_s22, 3 }
  0x38   : > { %764 = vmatmul.msk.f32.vlgmr.msra.gmra.mxu0 %vm253_vm0, %v248_v4  ;;  %s648_s22 = scalar_lea.sflag [#allocation4], %s1187_s14 }
  0xb5   : > { %v1202_v5 = vpop.f32.mrf.mxu0 }
  0xb6   : > { %521 = vrot.lane.b32.xlu2 %v1202_v5, %s1048_s23  ;;  %361 = vrot.lane.b32.xlu1 %v1202_v5, %s1049_s13 }
  0xb7   : > { %283 = vrot.lane.b32.xlu0 %v1202_v5, %s1050_s29  ;;  %s658_s29 = scalar_lea.hbm %s1300_s4, %s779_s28 }
  0xbe   : > { %440 = vrot.lane.b32.xlu2 %v1202_v5, %s1051_s30  ;;  %442 = vrot.lane.b32.xlu1 %v1202_v5, %s1052_s5 }
  0xbf   : > { %363 = vrot.lane.b32.xlu0 %v1202_v5, %s1053_s6  ;;  %s247_s6 = scalar_lea.vmem [#allocation8], %s760_s26  ;;  %s992_s26 = scalar_lea.hbm %s1300_s4, 16 }
  0xc7   : > { %519 = vrot.lane.b32.xlu0 %v1202_v5, %s1054_s7  ;;  %s660_s7 = sshll.u32 %s247_s6, 4  ;;  %s661_s7 = int_to_ptr.vmem [resolvable:$true] %s660_s7 }
 0x110   : > { %v522_v6 = vpop.permute.xlu2 %521 }
 0x111   : > { %774 = vmatpush.xpose.msk.msrb.mxu0 %vm285_vm1, %v522_v6 }
 0x118   : > { %v441_v11 = vpop.permute.xlu2 %440 }
 0x128   : > { %v362_v7 = vpop.permute.xlu1 %361 }
 0x129   : > { %v284_v8 = vpop.permute.xlu0 %283 }
 0x12a   : > { %765 = vmatpush.xpose.msk.msra.mxu1 %vm285_vm1, %v284_v8 }
 0x12d   : > { %766 = vmatmul.msk.f32.vlgmr.msra.gmra.mxu1 %vm285_vm1, %v1202_v5 }
 0x130   : > { %v443_v9 = vpop.permute.xlu1 %442 }
 0x131   : > { %v364_v10 = vpop.permute.xlu0 %363  ;;  %771 = vmatpush.xpose.msk.msrb.mxu1 %vm285_vm1, %v443_v9 }
 0x132   : > { %768 = vmatpush.xpose.msk.msra.mxu3 %vm285_vm1, %v364_v10 }
 0x135   : > { %769 = vmatmul.msk.f32.vlgmr.msra.gmra.mxu3 %vm285_vm1, %v362_v7  ;;  %772 = vmatmul.msk.f32.vlgmr.msrb.gmra.mxu1 %vm285_vm1, %v441_v11 }
 0x139   : > { %v520_v12 = vpop.permute.xlu0 %519 }
 0x13a   : > { %775 = vmatmul.msk.f32.vlgmr.msrb.gmra.mxu0 %vm285_vm1, %v520_v12 }
 0x1aa   : > { %v307_v16 = vpop.f32.mrf.mxu1 }
 0x1ab   : > { %v310_v17 = vsel %vm281_vm2, %v307_v16, -1e+30 }
 0x1ac   : > { %v311_v18 = vsel %vm285_vm1, %v310_v17, -inf }
 0x1ad   : > { %312 = vmax.xlane.f32.xlu1 %v311_v18 }
 0x1b2   : > { %v465_v19 = vpop.f32.mrf.mxu1 }
 0x1b3   : > { %v468_v20 = vsel %vm281_vm2, %v465_v19, -1e+30 }
 0x1b4   : > { %v469_v21 = vsel %vm285_vm1, %v468_v20, -inf }
 0x1b5   : > { %470 = vmax.xlane.f32.xlu0 %v469_v21 }
 0x1b7   : > { %v544_v25 = vpop.f32.mrf.mxu0 }
 0x1b8   : > { %v386_v22 = vpop.f32.mrf.mxu3  ;;  %v547_v26 = vsel %vm281_vm2, %v544_v25, -1e+30 }
 0x1b9   : > { %v389_v23 = vsel %vm281_vm2, %v386_v22, -1e+30  ;;  %v548_v27 = vsel %vm285_vm1, %v547_v26, -inf }
 0x1ba   : > { %v390_v24 = vsel %vm285_vm1, %v389_v23, -inf }
 0x1bb   : > { %391 = vmax.xlane.f32.xlu2 %v390_v24 }
 0x1c3   : > { %549 = vmax.xlane.f32.xlu2 %v548_v27 }
 0x1c9   : > { %414 = vrot.lane.b32.xlu0 %v1202_v5, %s1055_s9  ;;  %s662_s9 = sshll.u32 %s658_s29, 4  ;;  %s663_s9 = int_to_ptr.hbm [resolvable:$true] %s662_s9 }
 0x220   : > { %v313_v28 = vpop.xlane.xlu1 %312 }
 0x221   : > { %v314_v29 = vsub.f32 %v310_v17, %v313_v28 }
 0x223   : > { %v315_v30 = vmul.f32 1.442695, %v314_v29 }
 0x225   : > { %866 = vpow2.f32 %v315_v30 }
 0x228   : > { %v471_v31 = vpop.xlane.xlu0 %470 }
 0x229   : > { %v472_v32 = vsub.f32 %v468_v20, %v471_v31 }
 0x22b   : > { %v867_v33 = vpop.eup %866  ;;  %v473_v34 = vmul.f32 1.442695, %v472_v32 }
 0x22c   : > { %v317_v35 = vsel %vm285_vm1, %v867_v33, 0.0 }
 0x22d   : > { %868 = vpow2.f32 %v473_v34  ;;  %318 = vadd.xlane.f32.xlu1 %v317_v35 }
 0x22e   : > { %v392_v36 = vpop.xlane.xlu2 %391 }
 0x22f   : > { %v393_v37 = vsub.f32 %v389_v23, %v392_v36 }
 0x231   : > { %v394_v38 = vmul.f32 1.442695, %v393_v37 }
 0x233   : > { %v1226_v39 = vpop.eup %868  ;;  %870 = vpow2.f32 %v394_v38 }
 0x234   : > { %v475_v40 = vsel %vm285_vm1, %v1226_v39, 0.0 }
 0x235   : > { %476 = vadd.xlane.f32.xlu0 %v475_v40 }
 0x236   : > { %v550_v41 = vpop.xlane.xlu2 %549 }
 0x237   : > { %v551_v42 = vsub.f32 %v547_v26, %v550_v41  ;;  %v618_v41 = vld [vmem:[#allocation7 + $0x18] sm:$0xff] }
 0x238   : > { %638 = vmatpush.msra.mxu1 %v618_v41 }
 0x239   : > { %v1230_v43 = vpop.eup %870  ;;  %v552_v44 = vmul.f32 1.442695, %v551_v42  ;;  %v617_v42 = vld [vmem:[#allocation7 + $0x10] sm:$0xff] }
 0x23a   : > { %v396_v45 = vsel %vm285_vm1, %v1230_v43, 0.0  ;;  %639 = vmatpush.msra.mxu1 %v617_v42 }
 0x23b   : > { %872 = vpow2.f32 %v552_v44  ;;  %397 = vadd.xlane.f32.xlu2 %v396_v45  ;;  %v415_v49 = vpop.permute.xlu0 %414 }
 0x241   : > { %v1234_v46 = vpop.eup %872 }
 0x242   : > { %v554_v47 = vsel %vm285_vm1, %v1234_v46, 0.0 }
 0x243   : > { %555 = vadd.xlane.f32.xlu1 %v554_v47 }
 0x249   : > { %572 = vrot.lane.b32.xlu0 %v1202_v5, %s1056_s10  ;;  %s986_s10 = sshra.s32 %s663_s9, 4  ;;  %s987_s10 = int_to_ptr.hbm [resolvable:$true] %s986_s10 }
 0x24a   : > { %p993_p12 = scmp.lt.s32.totalorder %s987_s10, %s1300_s4 }
 0x253   : > { %335 = vrot.lane.b32.xlu2 %v1202_v5, %s1057_s21  ;;  %s988_s21 = scalar_lea.hbm %s987_s10, 8 }
 0x254   : > { %p989_p1 = scmp.ne.s32.totalorder %s987_s10, %s988_s21  ;;  %p994_p7 = scmp.lt.s32.totalorder %s992_s26, %s988_s21 }
 0x256   : > { %p990_p3 = pnand %p989_p1, %p1156_p4  ;;  %p995_p8 = por %p994_p7, %p993_p12 }
 0x258   : > { %p991_p5 = pneg %p990_p3 }
 0x25a   : > { %p996_p9 = pnand %p995_p8, %p991_p5 }
 0x25c   : > { %493 = vrot.lane.b32.xlu1 %v1202_v5, %s1058_s24 }
 0x2a0   : > { %v319_v48 = vpop.xlane.xlu1 %318 }
 0x2a1   : > { %874 = vrcp.f32 %v319_v48  ;;  %v331_v55 = vand.u32 2147483648, %v319_v48  ;;  %vm325_vm4 = vweird.f32 %v319_v48  ;;  %v329_v58 = vand.u32 2147483647, %v319_v48 }
 0x2a3   : > { %v332_v60 = vor.u32 1.1754944e-38, %v331_v55  ;;  %vm330_vm6 = vcmp.eq.f32.partialorder %v329_v58, 8.507059e+37 }
 0x2a7   : > { %v875_v50 = vpop.eup %874 }
 0x2a8   : > { %v321_v51 = vmul.f32 %v875_v50, %v319_v48  ;;  %v1241_v53 = vpop.xlane.xlu0 %476  ;;  %vm326_vm3 = vweird.f32 %v875_v50 }
 0x2a9   : > { %876 = vrcp.f32 %v1241_v53  ;;  %vm327_vm5 = vmor %vm325_vm4, %vm326_vm3  ;;  %v489_v25 = vand.u32 2147483648, %v1241_v53  ;;  %vm483_vm15 = vweird.f32 %v1241_v53  ;;  %v487_v27 = vand.u32 2147483647, %v1241_v53 }
 0x2aa   : > { %v322_v52 = vsub.f32 1.0, %v321_v51 }
 0x2ab   : > { %v490_v32 = vor.u32 1.1754944e-38, %v489_v25  ;;  %vm488_vm4 = vcmp.eq.f32.partialorder %v487_v27, 8.507059e+37 }
 0x2ac   : > { %v323_v54 = vmul.f32 %v875_v50, %v322_v52 }
 0x2ae   : > { %v398_v56 = vpop.xlane.xlu2 %397  ;;  %v324_v57 = vadd.f32 %v875_v50, %v323_v54 }
 0x2af   : > { %878 = vrcp.f32 %v398_v56  ;;  %v877_v62 = vpop.eup %876  ;;  %v410_v6 = vand.u32 2147483648, %v398_v56  ;;  %v408_v8 = vand.u32 2147483647, %v398_v56  ;;  %vm404_vm8 = vweird.f32 %v398_v56 }
 0x2b0   : > { %v328_v59 = vsel %vm327_vm5, %v875_v50, %v324_v57  ;;  %v479_v4 = vmul.f32 %v877_v62, %v1241_v53  ;;  %vm484_vm12 = vweird.f32 %v877_v62  ;;  %vm611_vm5 = vcmask 130048   ;;  %v865_v50 = vld [vmem:[%s1299_s3] ss:$0 sm:$0xff] }
 0x2b1   : > { %v333_v61 = vsel %vm330_vm6, %v332_v60, %v328_v59  ;;  %v411_v13 = vor.u32 1.1754944e-38, %v410_v6  ;;  %vm409_vm10 = vcmp.eq.f32.partialorder %v408_v8, 8.507059e+37  ;;  %vm485_vm3 = vmor %vm483_vm15, %vm484_vm12  ;;  %vm613_vm6 = vcmask 195584  }
 0x2b2   : > { %v334_v3 = vmul.f32 %v867_v33, %v333_v61  ;;  %v480_v10 = vsub.f32 1.0, %v479_v4 }
 0x2b4   : > { %v481_v17 = vmul.f32 %v877_v62, %v480_v10 }
 0x2b5   : > { %v879_v63 = vpop.eup %878 }
 0x2b6   : > { %v400_v0 = vmul.f32 %v879_v63, %v398_v56  ;;  %v556_v1 = vpop.xlane.xlu1 %555  ;;  %v336_v2 = vpop.permute.xlu2 %335  ;;  %vm405_vm7 = vweird.f32 %v879_v63  ;;  %v482_v23 = vadd.f32 %v877_v62, %v481_v17 }
 0x2b7   : > { %880 = vrcp.f32 %v556_v1  ;;  %356 = vmatpush.msra.mxu2 %v336_v2  ;;  %vm406_vm9 = vmor %vm404_vm8, %vm405_vm7  ;;  %v568_v20 = vand.u32 2147483648, %v556_v1  ;;  %v566_v22 = vand.u32 2147483647, %v556_v1  ;;  %vm562_vm13 = vweird.f32 %v556_v1 }
 0x2b8   : > { %v401_v5 = vsub.f32 1.0, %v400_v0  ;;  %767 = vmatmul.msk.f32.vlgmr.msra.gmra.mxu2 %vm285_vm1, %v334_v3  ;;  %v486_v31 = vsel %vm485_vm3, %v877_v62, %v482_v23 }
 0x2b9   : > { %435 = vmatpush.msrb.mxu2 %v415_v49  ;;  %v569_v26 = vor.u32 1.1754944e-38, %v568_v20  ;;  %vm567_vm2 = vcmp.eq.f32.partialorder %v566_v22, 8.507059e+37  ;;  %v491_v33 = vsel %vm488_vm4, %v490_v32, %v486_v31 }
 0x2ba   : > { %v402_v7 = vmul.f32 %v879_v63, %v401_v5  ;;  %v492_v35 = vmul.f32 %v1226_v39, %v491_v33  ;;  %v615_v39 = vld [vmem:[#allocation7] sm:$0xff] }
 0x2bb   : > { %v573_v9 = vpop.permute.xlu0 %572 }
 0x2bc   : > { %v403_v11 = vadd.f32 %v879_v63, %v402_v7  ;;  %593 = vmatpush.msra.mxu2 %v573_v9 }
 0x2bd   : > { %v881_v12 = vpop.eup %880 }
 0x2be   : > { %v558_v14 = vmul.f32 %v881_v12, %v556_v1  ;;  %v407_v15 = vsel %vm406_vm9, %v879_v63, %v403_v11  ;;  %vm563_vm11 = vweird.f32 %v881_v12 }
 0x2bf   : > { %v412_v16 = vsel %vm409_vm10, %v411_v13, %v407_v15  ;;  %vm564_vm14 = vmor %vm562_vm13, %vm563_vm11 }
 0x2c0   : > { %v559_v18 = vsub.f32 1.0, %v558_v14  ;;  %v413_v19 = vmul.f32 %v1230_v43, %v412_v16  ;;  %v616_v43 = vld [vmem:[#allocation7 + $0x8] sm:$0xff] }
 0x2c1   : > { %640 = vmatpush.msra.mxu1 %v616_v43 }
 0x2c2   : > { %v560_v21 = vmul.f32 %v881_v12, %v559_v18  ;;  %770 = vmatmul.msk.f32.vlgmr.msrb.gmra.mxu2 %vm285_vm1, %v413_v19 }
 0x2c3   : > { %641 = vmatpush.msra.mxu1 %v615_v39 }
 0x2c4   : > { %v561_v24 = vadd.f32 %v881_v12, %v560_v21 }
 0x2c6   : > { %v565_v28 = vsel %vm564_vm14, %v881_v12, %v561_v24 }
 0x2c7   : > { %v570_v29 = vsel %vm567_vm2, %v569_v26, %v565_v28 }
 0x2c8   : > { %v571_v30 = vmul.f32 %v1234_v46, %v570_v29 }
 0x2ca   : > { %776 = vmatmul.msk.f32.vlgmr.msra.gmra.mxu2 %vm285_vm1, %v571_v30 }
 0x2ce   : > { %v494_v34 = vpop.permute.xlu1 %493 }
 0x2cf   : > { %514 = vmatpush.msrb.mxu3 %v494_v34 }
 0x2d0   : > { %773 = vmatmul.msk.f32.vlgmr.msrb.gmra.mxu3 %vm285_vm1, %v492_v35 }
 0x33b   : > { %v358_v36 = vpop.f32.mrf.mxu2 }
 0x345   : > { %v437_v37 = vpop.f32.mrf.mxu2 }
 0x346   : > { %599 = vrot.lane.b32.xlu2 %v437_v37, %s1059_s25 }
 0x34d   : > { %v595_v38 = vpop.f32.mrf.mxu2 }
 0x34e   : > { %607 = vrot.lane.b32.xlu0 %v595_v38, %s1060_s12 }
 0x353   : > { %v516_v40 = vpop.f32.mrf.mxu3 }
 0x354   : > { %603 = vrot.lane.b32.xlu1 %v516_v40, %s1061_s27 }
 0x3a0   : > { %v600_v44 = vpop.permute.xlu2 %599 }
 0x3a1   : > { %v610_v45 = vsel %vm285_vm1, %v358_v36, %v600_v44 }
 0x3c0   : > { %v608_v47 = vpop.permute.xlu0 %607 }
 0x3c6   : > { %v604_v46 = vpop.permute.xlu1 %603 }
 0x3c7   : > { %v612_v48 = vsel %vm611_vm5, %v610_v45, %v604_v46 }
 0x3c8   : > { %v614_v49 = vsel %vm613_vm6, %v612_v48, %v608_v47 }
 0x3c9   : > { %777 = vmatmul.msk.f32.vlgmr.msra.gmra.mxu1 %vm253_vm0, %v614_v49 }
 0x446   : > { %v643_v51 = vpop.f32.mrf.mxu1 }
 0x447   : > { %v644_v52 = vadd.f32 %v865_v50, %v643_v51 }
 0x449   : > { %646 = vst.msk [vmem:[%s247_s6] sm:$0xff] %vm253_vm0, %v644_v52 }
 0x44a   : > { %999 = shalt.err (!%p996_p9)
}
 0x44b   : > { %792 = dma.vmem_to_hbm [thread:$0]  (%p1156_p4), %s661_s7, 128, %s663_s9, %s648_s22  }
 0x44c PF: > { %s674_s14 = sand.u32 1, %s1030_s15   ;;  %p1307_p10 = scmp.ge.s32.totalorder %s1042_s18, 2 }
 0x44d   : > { %s675_s28 = scalar_lea.sflag [#allocation4], %s674_s14 }
 0x44e   : > { %p806_p13 = pnand %p1307_p10, %p1160_p6 }
 0x450   : > { %p807_p11 = pneg %p806_p13 }
 0x452   : > { %1025 = dma.done.wait (%p807_p11), %s675_s28, 128  }
 0x453   : > { %1027 = vsyncadd (%p807_p11), %s675_s28, 4294967168  ;;  %p18_p0 = scmp.ge.s32.totalorder %s1130_s8, 4   ;;  %s1308_s15 = smov %s1034_s16 }
 0x454   : > { %s1309_s16 = smov %s1038_s17  ;;  %s1310_s17 = smov %s1141_s11 }
 0x455   : > { %s1311_s18 = smov %s1130_s8  ;;  %20 = sbr.rel (!%p18_p0) target bundleno = 6 (0x6), region = 89 }
 0x45a   :  { %681 = vsyncpa [#allocation3], 1 }
 0x45b   :  { %683 = vsyncpa [#allocation3 + $0x1], 1 }
 0x45c   :  { %684 = vsyncpa [#allocation6], 1 }
 0x45d   :  { %685 = vsyncpa [#allocation4], 1 }
 0x45e   :  { %687 = vsyncpa [#allocation4 + $0x1], 1 }

</bundles_post_ra>
